<compile_context>
chip_gen: v7x
topology: tpu7x:2x2x1
jax: 0.10.0
libtpu: 0.0.40
codegen_flags: <defaults>
</compile_context>

<pallas_src>
import functools

import jax
import jax.numpy as jnp
from jax.experimental import pallas as pl
from jax.experimental.pallas import tpu as pltpu


def _round_up(a, m):
    return ((a + m - 1) // m) * m


def _center_loss_kernel(x_ref, c_ref, o_ref, *, tb, batch):
    # x_ref: (TB, D) f32 VMEM -- batch tile of features
    # c_ref: (TB, D) f32 VMEM -- centers[labels] for the same rows (pre-gathered)
    # o_ref: (1, 1)  f32 SMEM -- per-tile partial sum
    i = pl.program_id(0)

    diff = x_ref[...].astype(jnp.float32) - c_ref[...].astype(jnp.float32)
    # Per-sample squared distance (one lane-axis reduce on the XLU per tile).
    d = jnp.sum(diff * diff, axis=1, keepdims=True)            # (TB, 1)
    # torch clamp(min=1e-12, max=1e12), applied per sample (per masked entry).
    d = jnp.clip(d, 1e-12, 1e12)
    # Zero out rows beyond the real batch (padding added by the wrapper).
    row = i * tb + jax.lax.broadcasted_iota(jnp.int32, (tb, 1), 0)
    d = jnp.where(row < batch, d, 0.0)

    o_ref[0, 0] = jnp.sum(d)                                    # tile partial


def center_loss(x, centers, labels):
    """Pallas CenterLoss forward.  x: (B, D), centers: (C, D), labels: (B,) int."""
    B, D = x.shape
    C, D2 = centers.shape
    assert D == D2

    # Guard against out-of-range labels ([0, C) contract).
    labels_i32 = jnp.clip(labels.astype(jnp.int32), 0, C - 1)
    # Gather centers[labels] once in XLA; the kernel then streams two dense
    # (B, D) operands with big tiles instead of one 512 B center row per step.
    gathered = jnp.take(centers, labels_i32, axis=0)            # (B, D)

    # Batch tile: >= 8 rows (f32 sublane count), up to 512 for DMA efficiency.
    tb = min(512, _round_up(B, 8))
    num_tiles = pl.cdiv(B, tb)
    b_pad = num_tiles * tb
    if b_pad != B:
        x = jnp.pad(x, ((0, b_pad - B), (0, 0)))
        gathered = jnp.pad(gathered, ((0, b_pad - B), (0, 0)))

    kernel = functools.partial(_center_loss_kernel, tb=tb, batch=B)

    partials = pl.pallas_call(
        kernel,
        out_shape=jax.ShapeDtypeStruct((num_tiles, 1), jnp.float32),
        grid_spec=pltpu.PrefetchScalarGridSpec(
            num_scalar_prefetch=0,
            grid=(num_tiles,),
            in_specs=[
                pl.BlockSpec((tb, D), lambda i: (i, 0)),        # x tile
                pl.BlockSpec((tb, D), lambda i: (i, 0)),        # gathered centers tile
            ],
            out_specs=pl.BlockSpec((1, 1), lambda i: (i, 0),
                                   memory_space=pltpu.MemorySpace.SMEM),
        ),
        # Tiles are independent (each writes its own partial) -> "parallel"
        # lets v7x's two TensorCores split the batch-tile axis.
        compiler_params=pltpu.CompilerParams(
            dimension_semantics=("parallel",),
        ),
    )(x, gathered)

    # Mean over the real batch, plus the B*(C-1) masked-out entries that
    # torch's clamp(min=1e-12) turns into 1e-12 each (=> (C-1)*1e-12 after /B).
    return jnp.sum(partials) / jnp.float32(B) + jnp.float32((C - 1) * 1e-12)


def _center_loss_ref(x, centers, labels):
    # Pure-JAX reference mirroring the PyTorch forward exactly (expanded form).
    B = x.shape[0]
    C = centers.shape[0]
    distmat = (
        jnp.sum(x ** 2, axis=1, keepdims=True)
        + jnp.sum(centers ** 2, axis=1)[None, :]
        - 2.0 * jnp.matmul(x, centers.T, precision=jax.lax.Precision.HIGHEST)
    )
    mask = (labels[:, None] == jnp.arange(C)[None, :]).astype(jnp.float32)
    dist = jnp.clip(distmat * mask, 1e-12, 1e12)
    return jnp.sum(dist) / B


if __name__ == "__main__":
    # CenterLoss(num_classes=16, feature_dim=128), batch=8.
    num_classes = 16
    feat_dim = 128
    batch = 8

    key = jax.random.PRNGKey(0)
    k_centers, k_x, k_labels = jax.random.split(key, 3)

    # nn.Parameter(torch.randn(num_classes, feat_dim)) -> standard normal init.
    centers = jax.random.normal(k_centers, (num_classes, feat_dim), dtype=jnp.float32)
    x = jax.random.normal(k_x, (batch, feat_dim), dtype=jnp.float32)
    labels = jax.random.randint(k_labels, (batch,), 0, num_classes, dtype=jnp.int32)

    loss = center_loss(x, centers, labels)
    jax.block_until_ready(loss)

    ref = _center_loss_ref(x, centers, labels)
    assert jnp.allclose(loss, ref, rtol=1e-4, atol=1e-3), (loss, ref)

    print("KERNEL_OK")
</pallas_src>

<mosaic_0001>
module attributes {stable_mosaic.version = 11 : i64} {
  func.func @_center_loss_kernel(%arg0: i32, %arg1: memref<8x128xf32, #tpu.memory_space<vmem>>, %arg2: memref<8x128xf32, #tpu.memory_space<vmem>>, %arg3: memref<1x1xf32, #tpu.memory_space<smem>>) attributes {dimension_semantics = [#tpu.dimension_semantics<parallel>], iteration_bounds = array<i64: 1>, scalar_prefetch = 0 : i64, scratch_operands = 0 : i64, tpu.core_type = #tpu.core_type<tc>, window_params = [{transform_indices = @transform_0, window_bounds = array<i64: 8, 128>}, {transform_indices = @transform_1, window_bounds = array<i64: 8, 128>}, {transform_indices = @transform_2, window_bounds = array<i64: 1, 1>}]} {
    %c0 = arith.constant 0 : index
    %c0_0 = arith.constant 0 : index
    %0 = vector.load %arg1[%c0, %c0_0] : memref<8x128xf32, #tpu.memory_space<vmem>>, vector<8x128xf32>
    %c0_1 = arith.constant 0 : index
    %c0_2 = arith.constant 0 : index
    %1 = vector.load %arg2[%c0_1, %c0_2] : memref<8x128xf32, #tpu.memory_space<vmem>>, vector<8x128xf32>
    %2 = arith.subf %0, %1 : vector<8x128xf32>
    %3 = arith.mulf %2, %2 : vector<8x128xf32>
    %cst = arith.constant dense<0.000000e+00> : vector<8xf32>
    %4 = vector.multi_reduction <add>, %3, %cst [1] : vector<8x128xf32> to vector<8xf32>
    %5 = vector.shape_cast %4 : vector<8xf32> to vector<8x1xf32>
    %cst_3 = arith.constant 9.99999996E-13 : f32
    %cst_4 = arith.constant 9.99999995E+11 : f32
    %6 = vector.broadcast %cst_3 : f32 to vector<8x1xf32>
    %7 = arith.maximumf %6, %5 : vector<8x1xf32>
    %8 = vector.broadcast %cst_4 : f32 to vector<8x1xf32>
    %9 = arith.minimumf %8, %7 : vector<8x1xf32>
    %c8_i32 = arith.constant 8 : i32
    %10 = arith.muli %arg0, %c8_i32 : i32
    %11 = tpu.iota {dimensions = array<i32: 0>} : vector<8x1xi32>
    %12 = vector.broadcast %10 : i32 to vector<8x1xi32>
    %13 = arith.addi %12, %11 : vector<8x1xi32>
    %c8_i32_5 = arith.constant 8 : i32
    %14 = vector.broadcast %c8_i32_5 : i32 to vector<8x1xi32>
    %15 = arith.cmpi slt, %13, %14 : vector<8x1xi32>
    %cst_6 = arith.constant 0.000000e+00 : f32
    %16 = vector.broadcast %cst_6 : f32 to vector<8x1xf32>
    %17 = arith.select %15, %9, %16 : vector<8x1xi1>, vector<8x1xf32>
    %18 = vector.shape_cast %17 : vector<8x1xf32> to vector<1x8x1xf32>
    %cst_7 = arith.constant dense<0.000000e+00> : vector<1xf32>
    %19 = vector.multi_reduction <add>, %18, %cst_7 [1, 2] : vector<1x8x1xf32> to vector<1xf32>
    %20 = vector.shape_cast %19 : vector<1xf32> to vector<1x1x1xf32>
    %21 = vector.extract %20[0, 0, 0] : f32 from vector<1x1x1xf32>
    %c0_8 = arith.constant 0 : index
    %c0_9 = arith.constant 0 : index
    %22 = memref.load %arg3[%c0_8, %c0_9] : memref<1x1xf32, #tpu.memory_space<smem>>
    memref.store %21, %arg3[%c0_8, %c0_9] : memref<1x1xf32, #tpu.memory_space<smem>>
    return
  }
  func.func @transform_0(%arg0: i32) -> (i32, i32) {
    %c0_i32 = arith.constant 0 : i32
    %c0_i32_0 = arith.constant 0 : i32
    return %arg0, %c0_i32 : i32, i32
  }
  func.func @transform_1(%arg0: i32) -> (i32, i32) {
    %c0_i32 = arith.constant 0 : i32
    %c0_i32_0 = arith.constant 0 : i32
    return %arg0, %c0_i32 : i32, i32
  }
  func.func @transform_2(%arg0: i32) -> (i32, i32) {
    %c0_i32 = arith.constant 0 : i32
    %c0_i32_0 = arith.constant 0 : i32
    return %arg0, %c0_i32 : i32, i32
  }
}

</mosaic_0001>

<bundles_post_ra>
// kernel: tpu_custom_call.1
= control target key start
LH: loop header
LB: loop body
LE: loop exit
PB: predicated region body
PF: predicated region fallthrough
CT: control target
= control target key end

     0   :  { %7 = vsyncpa [#allocation3], 0  ;;  %s198_s0 = inlined_call_operand.hbm [shape: f32[8,128], index: 0, kind: input, shape index: {}]   ;;  %s199_s1 = inlined_call_operand.hbm [shape: f32[8,128], index: 1, kind: input, shape index: {}]   ;;  %s200_s2 = inlined_call_operand.hbm [shape: f32[1,1], index: 2, kind: output, shape index: {}]  }
   0x1   :  { %8 = vsyncpa [#allocation6], 0 }
   0x2   :  { %9 = vsyncpa [#allocation4], 0  ;;  %s144_s9 = smov [#allocation2]   ;;  %s145_s11 = smov [#allocation5]  }
   0x3   :  { %s16_s10 = sshll.u32 %s144_s9, 4  ;;  %s26_s12 = sshll.u32 %s145_s11, 4  ;;  %s17_s10 = int_to_ptr.vmem [resolvable:$true] %s16_s10  ;;  %s27_s12 = int_to_ptr.vmem [resolvable:$true] %s26_s12 }
   0x4   :  { %s84_s15 = scalar_lea.hbm %s198_s0, 128 }
   0x5   :  { %p85_p0 = scmp.ne.s32.totalorder %s198_s0, %s84_s15  ;;  %p88_p1 = scmp.lt.u32.totalorder %s84_s15, %s198_s0 }
   0x7   :  { %p90_p2 = pnand %p88_p1, %p85_p0 }
   0x9   :  { %93 = shalt.err (!%p90_p2)
}
   0xa   :  { %s94_s20 = scalar_lea.vmem %s17_s10, 128  ;;  %p99_p4 = scmp.lt.s32.totalorder %s17_s10, %s17_s10 }
   0xb   :  { %p95_p3 = scmp.ne.s32.totalorder %s17_s10, %s94_s20  ;;  %p100_p5 = scmp.lt.s32.totalorder %s94_s20, %s94_s20 }
   0xd   :  { %p101_p6 = por %p100_p5, %p99_p4 }
   0xf   :  { %p102_p7 = pnand %p101_p6, %p95_p3 }
  0x11   :  { %105 = shalt.err (!%p102_p7)
}
  0x12   :  { %19 = dma.hbm_to_vmem [thread:$0]  %s198_s0, 128, %s17_s10, [#allocation3]  }
  0x13   :  { %s106_s25 = scalar_lea.hbm %s199_s1, 128 }
  0x14   :  { %p107_p8 = scmp.ne.s32.totalorder %s199_s1, %s106_s25  ;;  %p110_p9 = scmp.lt.u32.totalorder %s106_s25, %s199_s1 }
  0x16   :  { %p112_p10 = pnand %p110_p9, %p107_p8 }
  0x18   :  { %115 = shalt.err (!%p112_p10)
}
  0x19   :  { %s116_s30 = scalar_lea.vmem %s27_s12, 128  ;;  %p121_p12 = scmp.lt.s32.totalorder %s27_s12, %s27_s12 }
  0x1a   :  { %p117_p11 = scmp.ne.s32.totalorder %s27_s12, %s116_s30  ;;  %p122_p13 = scmp.lt.s32.totalorder %s116_s30, %s116_s30 }
  0x1c   :  { %p123_p0 = por %p122_p13, %p121_p12 }
  0x1e   :  { %p124_p1 = pnand %p123_p0, %p117_p11 }
  0x20   :  { %127 = shalt.err (!%p124_p1)
}
  0x21   :  { %29 = dma.hbm_to_vmem [thread:$0]  %s199_s1, 128, %s27_s12, [#allocation6]  }
  0x22   :  { %138 = dma.done.wait [#allocation3], 128  }
  0x23   :  { %139 = vsyncadd [#allocation3], 4294967168 }
  0x24   :  { %140 = dma.done.wait [#allocation6], 128  }
  0x25   :  { %141 = vsyncadd [#allocation6], 4294967168  ;;  %v36_v0 = vld [vmem:[#allocation2] sm:$0xff]  ;;  %v37_v1 = vld [vmem:[#allocation5] sm:$0xff]  ;;  %vm51_vm0 = vcmask 7168   ;;  %s128_s6 = scalar_lea.hbm %s200_s2, 16 }
  0x26   :  { %v38_v2 = vsub.f32 %v36_v0, %v37_v1  ;;  %p129_p2 = scmp.ne.s32.totalorder %s200_s2, %s128_s6  ;;  %p132_p3 = scmp.lt.u32.totalorder %s128_s6, %s200_s2 }
  0x28   :  { %v39_v3 = vmul.f32 %v38_v2, %v38_v2  ;;  %p134_p4 = pnand %p132_p3, %p129_p2 }
  0x2a   :  { %40 = vadd.xlane.f32.xlu0 %v39_v3 }
  0xb7   :  { %v41_v4 = vpop.xlane.xlu0 %40 }
  0xb8   :  { %v42_v5 = vmax.f32 %v41_v4, 1e-12 }
  0xba   :  { %v43_v6 = vmin.f32 %v42_v5, 1e+12 }
  0xbc   :  { %v52_v7 = vsel %vm51_vm0, %v43_v6, 0.0 }
  0xbd   :  { %53 = vadd.xlane.f32.xlu0 %v52_v7 }
 0x14a   :  { %v54_v8 = vpop.xlane.xlu0 %53 }
 0x14b   :  { %v55_v9 = vrot.slane %v54_v8, 4 }
 0x14d   :  { %v56_v10 = vadd.f32 %v55_v9, %v54_v8 }
 0x14f   :  { %v57_v11 = vrot.slane %v56_v10, 2 }
 0x151   :  { %v58_v12 = vadd.f32 %v57_v11, %v56_v10 }
 0x153   :  { %v59_v13 = vrot.slane %v58_v12, 1 }
 0x155   :  { %v60_v14 = vadd.f32 %v59_v13, %v58_v12 }
 0x157   :  { %79 = vpush %v60_v14 }
 0x188   :  { %s80_s1 = spop %79 }
 0x189   :  { %63 = sst [smem:[#allocation7]] %s80_s1 }
 0x18a   :  { %137 = shalt.err (!%p134_p4)
}
 0x18b   :  { %s146_s11 = smov [#allocation7]  }
 0x18c   :  { %71 = dma.smem_to_hbm %s146_s11, 16, %s200_s2, [#allocation4]  }
 0x18d   :  { %142 = dma.done.wait [#allocation4], 16  }
 0x18e   :  { %143 = vsyncadd [#allocation4], 4294967280 }
 0x18f   :  { %75 = sfence }
 0x190   :  { %76 = vsyncpa [#allocation3], 1 }
 0x191   :  { %77 = vsyncpa [#allocation6], 1 }
 0x192   :  { %78 = vsyncpa [#allocation4], 1 }

</bundles_post_ra>
